<compile_context>
chip_gen: v7x
topology: tpu7x:2x2x1
jax: 0.10.0
libtpu: 0.0.40
codegen_flags: <defaults>
</compile_context>

<pallas_src>
import functools

import jax
import jax.numpy as jnp
import numpy as np
from jax.experimental import pallas as pl
from jax.experimental.pallas import tpu as pltpu


# ----------------------------------------------------------------------------
# Host-side weight folding (pure numpy, runs once at module construction)
# ----------------------------------------------------------------------------
def _fold_conv(w, b, Hi, Wi, stride=2, pad=1):
    """Fold a 3x3/stride/pad-1 conv into per-dh (row-select, width-Toeplitz) mats.

    Returns (M, R, bias_tiled, Ho, Wo) with
      M[dh]      : (Wi*Cin, Wo*Cout)   width gather + weight contraction
      R[dh]      : (Ho, Hi)            selects input row 2*oh + dh - pad (0 if OOB)
      bias_tiled : (1, Wo*Cout)
    so that out[oh, ow*Cout+co] = relu( sum_dh ((R[dh] @ h) @ M[dh]) + bias ).
    """
    w = np.asarray(w, np.float32)                       # (Cout, Cin, kh, kw)
    b = np.asarray(b, np.float32)
    Cout, Cin, kh, kw = w.shape
    Ho = (Hi + 2 * pad - kh) // stride + 1
    Wo = (Wi + 2 * pad - kw) // stride + 1

    M = np.zeros((kh, Wi * Cin, Wo * Cout), np.float32)
    for dh in range(kh):
        for ow in range(Wo):
            for dw in range(kw):
                wi = stride * ow + dw - pad
                if 0 <= wi < Wi:
                    M[dh, wi * Cin:(wi + 1) * Cin,
                      ow * Cout:(ow + 1) * Cout] += w[:, :, dh, dw].T

    R = np.zeros((kh, Ho, Hi), np.float32)
    for dh in range(kh):
        for oh in range(Ho):
            hi = stride * oh + dh - pad
            if 0 <= hi < Hi:
                R[dh, oh, hi] = 1.0

    btile = np.tile(b, Wo).reshape(1, Wo * Cout)
    return (jnp.asarray(M, jnp.bfloat16), jnp.asarray(R, jnp.bfloat16),
            jnp.asarray(btile, jnp.float32), Ho, Wo)


def _flatten_perm(Ho, Wo, C):
    """Map 'ours' flatten order (h, w, c) -> PyTorch NCHW flatten order (c, h, w)."""
    perm = np.zeros(Ho * Wo * C, np.int64)
    for hh in range(Ho):
        for ww in range(Wo):
            for cc in range(C):
                perm[hh * Wo * C + ww * C + cc] = cc * Ho * Wo + hh * Wo + ww
    return perm


# ----------------------------------------------------------------------------
# The fused kernel: conv stack + fc stack + conditional actnorm, per batch elem
# ----------------------------------------------------------------------------
def _cactnorm_kernel(x_ref, y_ref,
                     m1_ref, r1_ref, cb1_ref,
                     m2_ref, r2_ref, cb2_ref,
                     m3_ref, r3_ref, cb3_ref,
                     w1t_ref, b1_ref, w2t_ref, b2_ref, w3t_ref, b3_ref,
                     v_ref, ld_ref, *, cy, dims, reverse):
    f32 = jnp.float32
    bf16 = jnp.bfloat16

    def conv_relu(h, m_ref, r_ref, b_ref):
        # h: (Hi, Wi*Cin) f32.  bf16 MXU operands, f32 accumulation.
        h16 = h.astype(bf16)
        acc = None
        for dh in range(3):
            hsel = jnp.dot(r_ref[dh], h16, preferred_element_type=f32)
            part = jnp.dot(hsel.astype(bf16), m_ref[dh],
                           preferred_element_type=f32)
            acc = part if acc is None else acc + part
        return jnp.maximum(acc + b_ref[...], 0.0)          # (Ho, Wo*Cout) f32

    # ---- conv stack (all in VMEM / registers) -------------------------------
    h = x_ref[0].astype(f32)                               # (H, W*C)
    h = conv_relu(h, m1_ref, r1_ref, cb1_ref)
    h = conv_relu(h, m2_ref, r2_ref, cb2_ref)
    h = conv_relu(h, m3_ref, r3_ref, cb3_ref)              # (H3, W3*Ch)

    # ---- fc stack; nn.Flatten folded into row-block slices of w1t ----------
    rows, rc = h.shape
    z = b1_ref[...]                                        # (1, hidden) f32
    for r in range(rows):
        z = z + jnp.dot(h[r:r + 1, :].astype(bf16),
                        w1t_ref[r * rc:(r + 1) * rc, :],
                        preferred_element_type=f32)
    z = jnp.maximum(z, 0.0)
    z = jnp.maximum(jnp.dot(z.astype(bf16), w2t_ref[...],
                            preferred_element_type=f32) + b2_ref[...], 0.0)
    z = jnp.dot(z.astype(bf16), w3t_ref[...],
                preferred_element_type=f32) + b3_ref[...]
    out = jnp.tanh(z)                                      # (1, 2*cy) f32

    # ---- conditional actnorm (f32 epilogue, v5e-safe) -----------------------
    rid = jax.lax.broadcasted_iota(jnp.int32, (cy, 2 * cy), 0)
    cid = jax.lax.broadcasted_iota(jnp.int32, (cy, 2 * cy), 1)
    sel_s = (cid == rid).astype(f32)
    sel_b = (cid == rid + cy).astype(f32)
    s_col = jnp.sum(sel_s * out, axis=1, keepdims=True)    # (cy, 1)
    b_col = jnp.sum(sel_b * out, axis=1, keepdims=True)    # (cy, 1)
    s_sum = jnp.sum(
        jnp.where(jax.lax.broadcasted_iota(jnp.int32, (1, 2 * cy), 1) < cy,
                  out, 0.0),
        axis=1, keepdims=True)                             # (1, 1)

    yb = y_ref[0]                                          # (cy, HW) f32
    if reverse:
        v = (yb - b_col) * jnp.exp(-s_col)
        dl = -dims * s_sum
    else:
        v = yb * jnp.exp(s_col) + b_col
        dl = dims * s_sum
    v_ref[0] = v.astype(v_ref.dtype)
    ld_ref[0] = dl.astype(ld_ref.dtype)


def _fused_apply(wts, x, y, *, reverse):
    (m1, r1, cb1, m2, r2, cb2, m3, r3, cb3,
     w1t, b1, w2t, b2, w3t, b3) = wts
    B, C, H, W = x.shape
    _, Cy, Hy, Wy = y.shape
    HW = Hy * Wy

    # One tiny layout fixup at the boundary (8 KiB input): NCHW -> (H, W*C).
    x2 = jnp.transpose(x.astype(jnp.float32), (0, 2, 3, 1)).reshape(B, H, W * C)
    y2 = y.astype(jnp.float32).reshape(B, Cy, HW)

    def full3(a):
        return pl.BlockSpec(a.shape, lambda b: (0, 0, 0))

    def full2(a):
        return pl.BlockSpec(a.shape, lambda b: (0, 0))

    v, ld = pl.pallas_call(
        functools.partial(_cactnorm_kernel, cy=Cy, dims=float(HW),
                          reverse=reverse),
        grid=(B,),
        in_specs=[
            pl.BlockSpec((1, H, W * C), lambda b: (b, 0, 0)),    # x
            pl.BlockSpec((1, Cy, HW), lambda b: (b, 0, 0)),      # y
            full3(m1), full3(r1), full2(cb1),                    # conv1
            full3(m2), full3(r2), full2(cb2),                    # conv2
            full3(m3), full3(r3), full2(cb3),                    # conv3
            full2(w1t), full2(b1), full2(w2t), full2(b2),        # fc
            full2(w3t), full2(b3),
        ],
        out_specs=(pl.BlockSpec((1, Cy, HW), lambda b: (b, 0, 0)),
                   pl.BlockSpec((1, 1, 1), lambda b: (b, 0, 0))),
        out_shape=(jax.ShapeDtypeStruct((B, Cy, HW), jnp.float32),
                   jax.ShapeDtypeStruct((B, 1, 1), jnp.float32)),
        compiler_params=pltpu.CompilerParams(
            dimension_semantics=("parallel",),        # batch -> both TCs on v7x
            vmem_limit_bytes=32 * 1024 * 1024),
    )(x2, y2, m1, r1, cb1, m2, r2, cb2, m3, r3, cb3,
      w1t, b1, w2t, b2, w3t, b3)

    return v.reshape(B, Cy, Hy, Wy), ld[:, 0, 0]


# ----------------------------------------------------------------------------
# cActnorm module
# ----------------------------------------------------------------------------
class CActnormPallas:
    def __init__(self, in_size=(4, 16, 16), y_channels=4, stride=2,
                 hidden_channels=8, hidden_size=32, key=None):
        C, H, W = in_size
        self.stride = stride
        self.y_channels = y_channels
        flat = int(hidden_channels * (H * W) // stride ** 6)
        self.flat = flat

        if key is None:
            key = jax.random.PRNGKey(42)
        keys = jax.random.split(key, 12)

        def w_init(k, shape):
            return 0.1 * jax.random.normal(k, shape, jnp.float32)

        # PyTorch-layout weights (used by the reference): (Cout, Cin, 3, 3).
        self.conv_w = [
            w_init(keys[0], (hidden_channels, C, 3, 3)),
            w_init(keys[1], (hidden_channels, hidden_channels, 3, 3)),
            w_init(keys[2], (hidden_channels, hidden_channels, 3, 3)),
        ]
        self.conv_b = [w_init(keys[3 + i], (hidden_channels,)) for i in range(3)]

        # NOTE: original LinearLayer(..., 'zeros') zero-inits the fc weights
        # (=> s == b == tanh(0) == 0); small random weights are used here so
        # the kernel is exercised non-trivially.
        self.fc_w = [
            w_init(keys[6], (hidden_size, flat)),
            w_init(keys[7], (hidden_size, hidden_size)),
            w_init(keys[8], (y_channels * 2, hidden_size)),
        ]
        self.fc_b = [
            w_init(keys[9], (hidden_size,)),
            w_init(keys[10], (hidden_size,)),
            w_init(keys[11], (y_channels * 2,)),
        ]

        # ---- host-side folding of the conv + flatten structure -------------
        m1, r1, cb1, H1, W1 = _fold_conv(self.conv_w[0], self.conv_b[0], H, W, stride)
        m2, r2, cb2, H2, W2 = _fold_conv(self.conv_w[1], self.conv_b[1], H1, W1, stride)
        m3, r3, cb3, H3, W3 = _fold_conv(self.conv_w[2], self.conv_b[2], H2, W2, stride)
        assert H3 * W3 * hidden_channels == flat, "flatten size mismatch"

        perm = _flatten_perm(H3, W3, hidden_channels)
        w1t = np.asarray(self.fc_w[0], np.float32)[:, perm].T      # (flat, hidden)
        w2t = np.asarray(self.fc_w[1], np.float32).T
        w3t = np.asarray(self.fc_w[2], np.float32).T

        self._kweights = (
            m1, r1, cb1, m2, r2, cb2, m3, r3, cb3,
            jnp.asarray(w1t, jnp.bfloat16),
            jnp.asarray(self.fc_b[0], jnp.float32).reshape(1, -1),
            jnp.asarray(w2t, jnp.bfloat16),
            jnp.asarray(self.fc_b[1], jnp.float32).reshape(1, -1),
            jnp.asarray(w3t, jnp.bfloat16),
            jnp.asarray(self.fc_b[2], jnp.float32).reshape(1, -1),
        )
        self._apply = {
            False: jax.jit(functools.partial(_fused_apply, reverse=False)),
            True: jax.jit(functools.partial(_fused_apply, reverse=True)),
        }

    def __call__(self, x, y, logdet=0.0, reverse=False):
        v, dlog = self._apply[bool(reverse)](self._kweights, x, y)
        return v, jnp.asarray(logdet, jnp.float32) + dlog


# ----------------------------------------------------------------------------
# Pure-JAX reference (mirrors the kernel's bf16-operand / f32-accum policy)
# ----------------------------------------------------------------------------
def _ref_forward(m, x, y, logdet=0.0, reverse=False):
    f32 = jnp.float32
    h = x.astype(f32)
    for w, b in zip(m.conv_w, m.conv_b):
        h = jax.lax.conv_general_dilated(
            h.astype(jnp.bfloat16), w.astype(jnp.bfloat16),
            (m.stride, m.stride), ((1, 1), (1, 1)),
            dimension_numbers=("NCHW", "OIHW", "NCHW"),
            preferred_element_type=f32) + b[None, :, None, None]
        h = jnp.maximum(h, 0.0)
    h = h.reshape(x.shape[0], -1)
    for i, (w, b) in enumerate(zip(m.fc_w, m.fc_b)):
        h = jnp.dot(h.astype(jnp.bfloat16), w.T.astype(jnp.bfloat16),
                    preferred_element_type=f32) + b
        h = jnp.tanh(h) if i == 2 else jnp.maximum(h, 0.0)
    s, b = jnp.split(h, 2, axis=1)
    log_s = s[:, :, None, None]
    bb = b[:, :, None, None]
    dims = y.shape[2] * y.shape[3]
    yf = y.astype(f32)
    if reverse:
        v = (yf - bb) * jnp.exp(-log_s)
        dlog = -dims * jnp.sum(log_s, axis=(1, 2, 3))
    else:
        v = yf * jnp.exp(log_s) + bb
        dlog = dims * jnp.sum(log_s, axis=(1, 2, 3))
    return v, logdet + dlog


if __name__ == "__main__":
    key = jax.random.PRNGKey(0)
    kx, ky, kp = jax.random.split(key, 3)

    B, C, H, W = 2, 4, 16, 16
    y_channels = 4
    x = jax.random.normal(kx, (B, C, H, W), jnp.float32)
    y = jax.random.normal(ky, (B, y_channels, H, W), jnp.float32)

    model = CActnormPallas(in_size=(C, H, W), y_channels=y_channels, stride=2,
                           hidden_channels=8, hidden_size=32, key=kp)

    # Forward path.
    v, ld = model(x, y, logdet=0.0, reverse=False)
    jax.block_until_ready((v, ld))
    v_ref, ld_ref = _ref_forward(model, x, y, logdet=0.0, reverse=False)
    assert v.shape == (B, y_channels, H, W) and ld.shape == (B,)
    assert jnp.allclose(v, v_ref, atol=1e-3, rtol=1e-3), "forward v mismatch"
    assert jnp.allclose(ld, ld_ref, atol=1e-1, rtol=1e-3), "forward logdet mismatch"

    # Reverse path.
    vr, ldr = model(x, y, logdet=0.0, reverse=True)
    jax.block_until_ready((vr, ldr))
    vr_ref, ldr_ref = _ref_forward(model, x, y, logdet=0.0, reverse=True)
    assert jnp.allclose(vr, vr_ref, atol=1e-3, rtol=1e-3), "reverse v mismatch"
    assert jnp.allclose(ldr, ldr_ref, atol=1e-1, rtol=1e-3), "reverse logdet mismatch"

    print("KERNEL_OK")
</pallas_src>

<mosaic_0001>
module attributes {stable_mosaic.version = 11 : i64} {
  func.func @_cactnorm_kernel(%arg0: i32, %arg1: memref<1x16x64xf32, #tpu.memory_space<vmem>>, %arg2: memref<1x4x256xf32, #tpu.memory_space<vmem>>, %arg3: memref<3x64x64xbf16, #tpu.memory_space<vmem>>, %arg4: memref<3x8x16xbf16, #tpu.memory_space<vmem>>, %arg5: memref<1x64xf32, #tpu.memory_space<vmem>>, %arg6: memref<3x64x32xbf16, #tpu.memory_space<vmem>>, %arg7: memref<3x4x8xbf16, #tpu.memory_space<vmem>>, %arg8: memref<1x32xf32, #tpu.memory_space<vmem>>, %arg9: memref<3x32x16xbf16, #tpu.memory_space<vmem>>, %arg10: memref<3x2x4xbf16, #tpu.memory_space<vmem>>, %arg11: memref<1x16xf32, #tpu.memory_space<vmem>>, %arg12: memref<32x32xbf16, #tpu.memory_space<vmem>>, %arg13: memref<1x32xf32, #tpu.memory_space<vmem>>, %arg14: memref<32x32xbf16, #tpu.memory_space<vmem>>, %arg15: memref<1x32xf32, #tpu.memory_space<vmem>>, %arg16: memref<32x8xbf16, #tpu.memory_space<vmem>>, %arg17: memref<1x8xf32, #tpu.memory_space<vmem>>, %arg18: memref<1x4x256xf32, #tpu.memory_space<vmem>>, %arg19: memref<1x1x1xf32, #tpu.memory_space<vmem>>) attributes {dimension_semantics = [#tpu.dimension_semantics<parallel>], iteration_bounds = array<i64: 2>, scalar_prefetch = 0 : i64, scratch_operands = 0 : i64, tpu.core_type = #tpu.core_type<tc>, window_params = [{transform_indices = @transform_0, window_bounds = array<i64: 1, 16, 64>}, {transform_indices = @transform_1, window_bounds = array<i64: 1, 4, 256>}, {pipeline_mode = #tpu.pipeline_mode<synchronous>, transform_indices = @transform_2, window_bounds = array<i64: 3, 64, 64>}, {pipeline_mode = #tpu.pipeline_mode<synchronous>, transform_indices = @transform_3, window_bounds = array<i64: 3, 8, 16>}, {pipeline_mode = #tpu.pipeline_mode<synchronous>, transform_indices = @transform_4, window_bounds = array<i64: 1, 64>}, {pipeline_mode = #tpu.pipeline_mode<synchronous>, transform_indices = @transform_5, window_bounds = array<i64: 3, 64, 32>}, {pipeline_mode = #tpu.pipeline_mode<synchronous>, transform_indices = @transform_6, window_bounds = array<i64: 3, 4, 8>}, {pipeline_mode = #tpu.pipeline_mode<synchronous>, transform_indices = @transform_7, window_bounds = array<i64: 1, 32>}, {pipeline_mode = #tpu.pipeline_mode<synchronous>, transform_indices = @transform_8, window_bounds = array<i64: 3, 32, 16>}, {pipeline_mode = #tpu.pipeline_mode<synchronous>, transform_indices = @transform_9, window_bounds = array<i64: 3, 2, 4>}, {pipeline_mode = #tpu.pipeline_mode<synchronous>, transform_indices = @transform_10, window_bounds = array<i64: 1, 16>}, {pipeline_mode = #tpu.pipeline_mode<synchronous>, transform_indices = @transform_11, window_bounds = array<i64: 32, 32>}, {pipeline_mode = #tpu.pipeline_mode<synchronous>, transform_indices = @transform_12, window_bounds = array<i64: 1, 32>}, {pipeline_mode = #tpu.pipeline_mode<synchronous>, transform_indices = @transform_13, window_bounds = array<i64: 32, 32>}, {pipeline_mode = #tpu.pipeline_mode<synchronous>, transform_indices = @transform_14, window_bounds = array<i64: 1, 32>}, {pipeline_mode = #tpu.pipeline_mode<synchronous>, transform_indices = @transform_15, window_bounds = array<i64: 32, 8>}, {pipeline_mode = #tpu.pipeline_mode<synchronous>, transform_indices = @transform_16, window_bounds = array<i64: 1, 8>}, {transform_indices = @transform_17, window_bounds = array<i64: 1, 4, 256>}, {transform_indices = @transform_18, window_bounds = array<i64: 1, 1, 1>}]} {
    %c0 = arith.constant 0 : index
    %c0_0 = arith.constant 0 : index
    %c0_1 = arith.constant 0 : index
    %0 = vector.load %arg1[%c0, %c0_0, %c0_1] : memref<1x16x64xf32, #tpu.memory_space<vmem>>, vector<1x16x64xf32>
    %1 = vector.shape_cast %0 : vector<1x16x64xf32> to vector<16x64xf32>
    %2 = arith.truncf %1 : vector<16x64xf32> to vector<16x64xbf16>
    %c0_2 = arith.constant 0 : index
    %c0_3 = arith.constant 0 : index
    %c0_4 = arith.constant 0 : index
    %3 = vector.load %arg4[%c0_2, %c0_3, %c0_4] : memref<3x8x16xbf16, #tpu.memory_space<vmem>>, vector<1x8x16xbf16>
    %4 = vector.shape_cast %3 : vector<1x8x16xbf16> to vector<8x16xbf16>
    %cst = arith.constant dense<0.000000e+00> : vector<8x64xf32>
    %5 = tpu.matmul %4, %2, %cst {dimension_numbers = #tpu.dot_dimension_numbers<[1], [0], [0], [1], [0, 0, 1, 1], [], []>} : vector<8x16xbf16>, vector<16x64xbf16>, vector<8x64xf32> -> vector<8x64xf32>
    %6 = arith.truncf %5 : vector<8x64xf32> to vector<8x64xbf16>
    %c0_5 = arith.constant 0 : index
    %c0_6 = arith.constant 0 : index
    %c0_7 = arith.constant 0 : index
    %7 = vector.load %arg3[%c0_5, %c0_6, %c0_7] : memref<3x64x64xbf16, #tpu.memory_space<vmem>>, vector<1x64x64xbf16>
    %8 = vector.shape_cast %7 : vector<1x64x64xbf16> to vector<64x64xbf16>
    %cst_8 = arith.constant dense<0.000000e+00> : vector<8x64xf32>
    %9 = tpu.matmul %6, %8, %cst_8 {dimension_numbers = #tpu.dot_dimension_numbers<[1], [0], [0], [1], [0, 0, 1, 1], [], []>} : vector<8x64xbf16>, vector<64x64xbf16>, vector<8x64xf32> -> vector<8x64xf32>
    %c1 = arith.constant 1 : index
    %c0_9 = arith.constant 0 : index
    %c0_10 = arith.constant 0 : index
    %10 = vector.load %arg4[%c1, %c0_9, %c0_10] : memref<3x8x16xbf16, #tpu.memory_space<vmem>>, vector<1x8x16xbf16>
    %11 = vector.shape_cast %10 : vector<1x8x16xbf16> to vector<8x16xbf16>
    %cst_11 = arith.constant dense<0.000000e+00> : vector<8x64xf32>
    %12 = tpu.matmul %11, %2, %cst_11 {dimension_numbers = #tpu.dot_dimension_numbers<[1], [0], [0], [1], [0, 0, 1, 1], [], []>} : vector<8x16xbf16>, vector<16x64xbf16>, vector<8x64xf32> -> vector<8x64xf32>
    %13 = arith.truncf %12 : vector<8x64xf32> to vector<8x64xbf16>
    %c1_12 = arith.constant 1 : index
    %c0_13 = arith.constant 0 : index
    %c0_14 = arith.constant 0 : index
    %14 = vector.load %arg3[%c1_12, %c0_13, %c0_14] : memref<3x64x64xbf16, #tpu.memory_space<vmem>>, vector<1x64x64xbf16>
    %15 = vector.shape_cast %14 : vector<1x64x64xbf16> to vector<64x64xbf16>
    %cst_15 = arith.constant dense<0.000000e+00> : vector<8x64xf32>
    %16 = tpu.matmul %13, %15, %cst_15 {dimension_numbers = #tpu.dot_dimension_numbers<[1], [0], [0], [1], [0, 0, 1, 1], [], []>} : vector<8x64xbf16>, vector<64x64xbf16>, vector<8x64xf32> -> vector<8x64xf32>
    %17 = arith.addf %9, %16 : vector<8x64xf32>
    %c2 = arith.constant 2 : index
    %c0_16 = arith.constant 0 : index
    %c0_17 = arith.constant 0 : index
    %18 = vector.load %arg4[%c2, %c0_16, %c0_17] : memref<3x8x16xbf16, #tpu.memory_space<vmem>>, vector<1x8x16xbf16>
    %19 = vector.shape_cast %18 : vector<1x8x16xbf16> to vector<8x16xbf16>
    %cst_18 = arith.constant dense<0.000000e+00> : vector<8x64xf32>
    %20 = tpu.matmul %19, %2, %cst_18 {dimension_numbers = #tpu.dot_dimension_numbers<[1], [0], [0], [1], [0, 0, 1, 1], [], []>} : vector<8x16xbf16>, vector<16x64xbf16>, vector<8x64xf32> -> vector<8x64xf32>
    %21 = arith.truncf %20 : vector<8x64xf32> to vector<8x64xbf16>
    %c2_19 = arith.constant 2 : index
    %c0_20 = arith.constant 0 : index
    %c0_21 = arith.constant 0 : index
    %22 = vector.load %arg3[%c2_19, %c0_20, %c0_21] : memref<3x64x64xbf16, #tpu.memory_space<vmem>>, vector<1x64x64xbf16>
    %23 = vector.shape_cast %22 : vector<1x64x64xbf16> to vector<64x64xbf16>
    %cst_22 = arith.constant dense<0.000000e+00> : vector<8x64xf32>
    %24 = tpu.matmul %21, %23, %cst_22 {dimension_numbers = #tpu.dot_dimension_numbers<[1], [0], [0], [1], [0, 0, 1, 1], [], []>} : vector<8x64xbf16>, vector<64x64xbf16>, vector<8x64xf32> -> vector<8x64xf32>
    %25 = arith.addf %17, %24 : vector<8x64xf32>
    %c0_23 = arith.constant 0 : index
    %c0_24 = arith.constant 0 : index
    %26 = vector.load %arg5[%c0_23, %c0_24] : memref<1x64xf32, #tpu.memory_space<vmem>>, vector<1x64xf32>
    %27 = vector.broadcast %26 : vector<1x64xf32> to vector<8x64xf32>
    %28 = arith.addf %25, %27 : vector<8x64xf32>
    %cst_25 = arith.constant 0.000000e+00 : f32
    %29 = vector.broadcast %cst_25 : f32 to vector<8x64xf32>
    %30 = arith.maximumf %28, %29 : vector<8x64xf32>
    %31 = arith.truncf %30 : vector<8x64xf32> to vector<8x64xbf16>
    %c0_26 = arith.constant 0 : index
    %c0_27 = arith.constant 0 : index
    %c0_28 = arith.constant 0 : index
    %32 = vector.load %arg7[%c0_26, %c0_27, %c0_28] : memref<3x4x8xbf16, #tpu.memory_space<vmem>>, vector<1x4x8xbf16>
    %33 = vector.shape_cast %32 : vector<1x4x8xbf16> to vector<4x8xbf16>
    %cst_29 = arith.constant dense<0.000000e+00> : vector<4x64xf32>
    %34 = tpu.matmul %33, %31, %cst_29 {dimension_numbers = #tpu.dot_dimension_numbers<[1], [0], [0], [1], [0, 0, 1, 1], [], []>} : vector<4x8xbf16>, vector<8x64xbf16>, vector<4x64xf32> -> vector<4x64xf32>
    %35 = arith.truncf %34 : vector<4x64xf32> to vector<4x64xbf16>
    %c0_30 = arith.constant 0 : index
    %c0_31 = arith.constant 0 : index
    %c0_32 = arith.constant 0 : index
    %36 = vector.load %arg6[%c0_30, %c0_31, %c0_32] : memref<3x64x32xbf16, #tpu.memory_space<vmem>>, vector<1x64x32xbf16>
    %37 = vector.shape_cast %36 : vector<1x64x32xbf16> to vector<64x32xbf16>
    %cst_33 = arith.constant dense<0.000000e+00> : vector<4x32xf32>
    %38 = tpu.matmul %35, %37, %cst_33 {dimension_numbers = #tpu.dot_dimension_numbers<[1], [0], [0], [1], [0, 0, 1, 1], [], []>} : vector<4x64xbf16>, vector<64x32xbf16>, vector<4x32xf32> -> vector<4x32xf32>
    %c1_34 = arith.constant 1 : index
    %c0_35 = arith.constant 0 : index
    %c0_36 = arith.constant 0 : index
    %39 = vector.load %arg7[%c1_34, %c0_35, %c0_36] : memref<3x4x8xbf16, #tpu.memory_space<vmem>>, vector<1x4x8xbf16>
    %40 = vector.shape_cast %39 : vector<1x4x8xbf16> to vector<4x8xbf16>
    %cst_37 = arith.constant dense<0.000000e+00> : vector<4x64xf32>
    %41 = tpu.matmul %40, %31, %cst_37 {dimension_numbers = #tpu.dot_dimension_numbers<[1], [0], [0], [1], [0, 0, 1, 1], [], []>} : vector<4x8xbf16>, vector<8x64xbf16>, vector<4x64xf32> -> vector<4x64xf32>
    %42 = arith.truncf %41 : vector<4x64xf32> to vector<4x64xbf16>
    %c1_38 = arith.constant 1 : index
    %c0_39 = arith.constant 0 : index
    %c0_40 = arith.constant 0 : index
    %43 = vector.load %arg6[%c1_38, %c0_39, %c0_40] : memref<3x64x32xbf16, #tpu.memory_space<vmem>>, vector<1x64x32xbf16>
    %44 = vector.shape_cast %43 : vector<1x64x32xbf16> to vector<64x32xbf16>
    %cst_41 = arith.constant dense<0.000000e+00> : vector<4x32xf32>
    %45 = tpu.matmul %42, %44, %cst_41 {dimension_numbers = #tpu.dot_dimension_numbers<[1], [0], [0], [1], [0, 0, 1, 1], [], []>} : vector<4x64xbf16>, vector<64x32xbf16>, vector<4x32xf32> -> vector<4x32xf32>
    %46 = arith.addf %38, %45 : vector<4x32xf32>
    %c2_42 = arith.constant 2 : index
    %c0_43 = arith.constant 0 : index
    %c0_44 = arith.constant 0 : index
    %47 = vector.load %arg7[%c2_42, %c0_43, %c0_44] : memref<3x4x8xbf16, #tpu.memory_space<vmem>>, vector<1x4x8xbf16>
    %48 = vector.shape_cast %47 : vector<1x4x8xbf16> to vector<4x8xbf16>
    %cst_45 = arith.constant dense<0.000000e+00> : vector<4x64xf32>
    %49 = tpu.matmul %48, %31, %cst_45 {dimension_numbers = #tpu.dot_dimension_numbers<[1], [0], [0], [1], [0, 0, 1, 1], [], []>} : vector<4x8xbf16>, vector<8x64xbf16>, vector<4x64xf32> -> vector<4x64xf32>
    %50 = arith.truncf %49 : vector<4x64xf32> to vector<4x64xbf16>
    %c2_46 = arith.constant 2 : index
    %c0_47 = arith.constant 0 : index
    %c0_48 = arith.constant 0 : index
    %51 = vector.load %arg6[%c2_46, %c0_47, %c0_48] : memref<3x64x32xbf16, #tpu.memory_space<vmem>>, vector<1x64x32xbf16>
    %52 = vector.shape_cast %51 : vector<1x64x32xbf16> to vector<64x32xbf16>
    %cst_49 = arith.constant dense<0.000000e+00> : vector<4x32xf32>
    %53 = tpu.matmul %50, %52, %cst_49 {dimension_numbers = #tpu.dot_dimension_numbers<[1], [0], [0], [1], [0, 0, 1, 1], [], []>} : vector<4x64xbf16>, vector<64x32xbf16>, vector<4x32xf32> -> vector<4x32xf32>
    %54 = arith.addf %46, %53 : vector<4x32xf32>
    %c0_50 = arith.constant 0 : index
    %c0_51 = arith.constant 0 : index
    %55 = vector.load %arg8[%c0_50, %c0_51] : memref<1x32xf32, #tpu.memory_space<vmem>>, vector<1x32xf32>
    %56 = vector.broadcast %55 : vector<1x32xf32> to vector<4x32xf32>
    %57 = arith.addf %54, %56 : vector<4x32xf32>
    %cst_52 = arith.constant 0.000000e+00 : f32
    %58 = vector.broadcast %cst_52 : f32 to vector<4x32xf32>
    %59 = arith.maximumf %57, %58 : vector<4x32xf32>
    %60 = arith.truncf %59 : vector<4x32xf32> to vector<4x32xbf16>
    %c0_53 = arith.constant 0 : index
    %c0_54 = arith.constant 0 : index
    %c0_55 = arith.constant 0 : index
    %61 = vector.load %arg10[%c0_53, %c0_54, %c0_55] : memref<3x2x4xbf16, #tpu.memory_space<vmem>>, vector<1x2x4xbf16>
    %62 = vector.shape_cast %61 : vector<1x2x4xbf16> to vector<2x4xbf16>
    %cst_56 = arith.constant dense<0.000000e+00> : vector<2x32xf32>
    %63 = tpu.matmul %62, %60, %cst_56 {dimension_numbers = #tpu.dot_dimension_numbers<[1], [0], [0], [1], [0, 0, 1, 1], [], []>} : vector<2x4xbf16>, vector<4x32xbf16>, vector<2x32xf32> -> vector<2x32xf32>
    %64 = arith.truncf %63 : vector<2x32xf32> to vector<2x32xbf16>
    %c0_57 = arith.constant 0 : index
    %c0_58 = arith.constant 0 : index
    %c0_59 = arith.constant 0 : index
    %65 = vector.load %arg9[%c0_57, %c0_58, %c0_59] : memref<3x32x16xbf16, #tpu.memory_space<vmem>>, vector<1x32x16xbf16>
    %66 = vector.shape_cast %65 : vector<1x32x16xbf16> to vector<32x16xbf16>
    %cst_60 = arith.constant dense<0.000000e+00> : vector<2x16xf32>
    %67 = tpu.matmul %64, %66, %cst_60 {dimension_numbers = #tpu.dot_dimension_numbers<[1], [0], [0], [1], [0, 0, 1, 1], [], []>} : vector<2x32xbf16>, vector<32x16xbf16>, vector<2x16xf32> -> vector<2x16xf32>
    %c1_61 = arith.constant 1 : index
    %c0_62 = arith.constant 0 : index
    %c0_63 = arith.constant 0 : index
    %68 = vector.load %arg10[%c1_61, %c0_62, %c0_63] : memref<3x2x4xbf16, #tpu.memory_space<vmem>>, vector<1x2x4xbf16>
    %69 = vector.shape_cast %68 : vector<1x2x4xbf16> to vector<2x4xbf16>
    %cst_64 = arith.constant dense<0.000000e+00> : vector<2x32xf32>
    %70 = tpu.matmul %69, %60, %cst_64 {dimension_numbers = #tpu.dot_dimension_numbers<[1], [0], [0], [1], [0, 0, 1, 1], [], []>} : vector<2x4xbf16>, vector<4x32xbf16>, vector<2x32xf32> -> vector<2x32xf32>
    %71 = arith.truncf %70 : vector<2x32xf32> to vector<2x32xbf16>
    %c1_65 = arith.constant 1 : index
    %c0_66 = arith.constant 0 : index
    %c0_67 = arith.constant 0 : index
    %72 = vector.load %arg9[%c1_65, %c0_66, %c0_67] : memref<3x32x16xbf16, #tpu.memory_space<vmem>>, vector<1x32x16xbf16>
    %73 = vector.shape_cast %72 : vector<1x32x16xbf16> to vector<32x16xbf16>
    %cst_68 = arith.constant dense<0.000000e+00> : vector<2x16xf32>
    %74 = tpu.matmul %71, %73, %cst_68 {dimension_numbers = #tpu.dot_dimension_numbers<[1], [0], [0], [1], [0, 0, 1, 1], [], []>} : vector<2x32xbf16>, vector<32x16xbf16>, vector<2x16xf32> -> vector<2x16xf32>
    %75 = arith.addf %67, %74 : vector<2x16xf32>
    %c2_69 = arith.constant 2 : index
    %c0_70 = arith.constant 0 : index
    %c0_71 = arith.constant 0 : index
    %76 = vector.load %arg10[%c2_69, %c0_70, %c0_71] : memref<3x2x4xbf16, #tpu.memory_space<vmem>>, vector<1x2x4xbf16>
    %77 = vector.shape_cast %76 : vector<1x2x4xbf16> to vector<2x4xbf16>
    %cst_72 = arith.constant dense<0.000000e+00> : vector<2x32xf32>
    %78 = tpu.matmul %77, %60, %cst_72 {dimension_numbers = #tpu.dot_dimension_numbers<[1], [0], [0], [1], [0, 0, 1, 1], [], []>} : vector<2x4xbf16>, vector<4x32xbf16>, vector<2x32xf32> -> vector<2x32xf32>
    %79 = arith.truncf %78 : vector<2x32xf32> to vector<2x32xbf16>
    %c2_73 = arith.constant 2 : index
    %c0_74 = arith.constant 0 : index
    %c0_75 = arith.constant 0 : index
    %80 = vector.load %arg9[%c2_73, %c0_74, %c0_75] : memref<3x32x16xbf16, #tpu.memory_space<vmem>>, vector<1x32x16xbf16>
    %81 = vector.shape_cast %80 : vector<1x32x16xbf16> to vector<32x16xbf16>
    %cst_76 = arith.constant dense<0.000000e+00> : vector<2x16xf32>
    %82 = tpu.matmul %79, %81, %cst_76 {dimension_numbers = #tpu.dot_dimension_numbers<[1], [0], [0], [1], [0, 0, 1, 1], [], []>} : vector<2x32xbf16>, vector<32x16xbf16>, vector<2x16xf32> -> vector<2x16xf32>
    %83 = arith.addf %75, %82 : vector<2x16xf32>
    %c0_77 = arith.constant 0 : index
    %c0_78 = arith.constant 0 : index
    %84 = vector.load %arg11[%c0_77, %c0_78] : memref<1x16xf32, #tpu.memory_space<vmem>>, vector<1x16xf32>
    %85 = vector.broadcast %84 : vector<1x16xf32> to vector<2x16xf32>
    %86 = arith.addf %83, %85 : vector<2x16xf32>
    %cst_79 = arith.constant 0.000000e+00 : f32
    %87 = vector.broadcast %cst_79 : f32 to vector<2x16xf32>
    %88 = arith.maximumf %86, %87 : vector<2x16xf32>
    %c0_80 = arith.constant 0 : index
    %c0_81 = arith.constant 0 : index
    %89 = vector.load %arg13[%c0_80, %c0_81] : memref<1x32xf32, #tpu.memory_space<vmem>>, vector<1x32xf32>
    %90 = vector.extract_strided_slice %88 {offsets = [0, 0], sizes = [1, 16], strides = [1, 1]} : vector<2x16xf32> to vector<1x16xf32>
    %91 = arith.truncf %90 : vector<1x16xf32> to vector<1x16xbf16>
    %c0_82 = arith.constant 0 : index
    %c0_83 = arith.constant 0 : index
    %92 = vector.load %arg12[%c0_82, %c0_83] : memref<32x32xbf16, #tpu.memory_space<vmem>>, vector<16x32xbf16>
    %cst_84 = arith.constant dense<0.000000e+00> : vector<1x32xf32>
    %93 = tpu.matmul %91, %92, %cst_84 {dimension_numbers = #tpu.dot_dimension_numbers<[1], [0], [0], [1], [0, 0, 1, 1], [], []>} : vector<1x16xbf16>, vector<16x32xbf16>, vector<1x32xf32> -> vector<1x32xf32>
    %94 = arith.addf %89, %93 : vector<1x32xf32>
    %95 = vector.extract_strided_slice %88 {offsets = [1, 0], sizes = [1, 16], strides = [1, 1]} : vector<2x16xf32> to vector<1x16xf32>
    %96 = arith.truncf %95 : vector<1x16xf32> to vector<1x16xbf16>
    %c16 = arith.constant 16 : index
    %c0_85 = arith.constant 0 : index
    %97 = vector.load %arg12[%c16, %c0_85] : memref<32x32xbf16, #tpu.memory_space<vmem>>, vector<16x32xbf16>
    %cst_86 = arith.constant dense<0.000000e+00> : vector<1x32xf32>
    %98 = tpu.matmul %96, %97, %cst_86 {dimension_numbers = #tpu.dot_dimension_numbers<[1], [0], [0], [1], [0, 0, 1, 1], [], []>} : vector<1x16xbf16>, vector<16x32xbf16>, vector<1x32xf32> -> vector<1x32xf32>
    %99 = arith.addf %94, %98 : vector<1x32xf32>
    %cst_87 = arith.constant 0.000000e+00 : f32
    %100 = vector.broadcast %cst_87 : f32 to vector<1x32xf32>
    %101 = arith.maximumf %99, %100 : vector<1x32xf32>
    %102 = arith.truncf %101 : vector<1x32xf32> to vector<1x32xbf16>
    %c0_88 = arith.constant 0 : index
    %c0_89 = arith.constant 0 : index
    %103 = vector.load %arg14[%c0_88, %c0_89] : memref<32x32xbf16, #tpu.memory_space<vmem>>, vector<32x32xbf16>
    %cst_90 = arith.constant dense<0.000000e+00> : vector<1x32xf32>
    %104 = tpu.matmul %102, %103, %cst_90 {dimension_numbers = #tpu.dot_dimension_numbers<[1], [0], [0], [1], [0, 0, 1, 1], [], []>} : vector<1x32xbf16>, vector<32x32xbf16>, vector<1x32xf32> -> vector<1x32xf32>
    %c0_91 = arith.constant 0 : index
    %c0_92 = arith.constant 0 : index
    %105 = vector.load %arg15[%c0_91, %c0_92] : memref<1x32xf32, #tpu.memory_space<vmem>>, vector<1x32xf32>
    %106 = arith.addf %104, %105 : vector<1x32xf32>
    %cst_93 = arith.constant 0.000000e+00 : f32
    %107 = vector.broadcast %cst_93 : f32 to vector<1x32xf32>
    %108 = arith.maximumf %106, %107 : vector<1x32xf32>
    %109 = arith.truncf %108 : vector<1x32xf32> to vector<1x32xbf16>
    %c0_94 = arith.constant 0 : index
    %c0_95 = arith.constant 0 : index
    %110 = vector.load %arg16[%c0_94, %c0_95] : memref<32x8xbf16, #tpu.memory_space<vmem>>, vector<32x8xbf16>
    %cst_96 = arith.constant dense<0.000000e+00> : vector<1x8xf32>
    %111 = tpu.matmul %109, %110, %cst_96 {dimension_numbers = #tpu.dot_dimension_numbers<[1], [0], [0], [1], [0, 0, 1, 1], [], []>} : vector<1x32xbf16>, vector<32x8xbf16>, vector<1x8xf32> -> vector<1x8xf32>
    %c0_97 = arith.constant 0 : index
    %c0_98 = arith.constant 0 : index
    %112 = vector.load %arg17[%c0_97, %c0_98] : memref<1x8xf32, #tpu.memory_space<vmem>>, vector<1x8xf32>
    %113 = arith.addf %111, %112 : vector<1x8xf32>
    %114 = math.tanh %113 : vector<1x8xf32>
    %115 = tpu.iota {dimensions = array<i32: 0>} : vector<4x8xi32>
    %116 = tpu.iota {dimensions = array<i32: 1>} : vector<4x8xi32>
    %117 = arith.cmpi eq, %116, %115 : vector<4x8xi32>
    %118 = arith.extui %117 : vector<4x8xi1> to vector<4x8xi32>
    %119 = arith.sitofp %118 : vector<4x8xi32> to vector<4x8xf32>
    %c4_i32 = arith.constant 4 : i32
    %120 = vector.broadcast %c4_i32 : i32 to vector<4x8xi32>
    %121 = arith.addi %115, %120 : vector<4x8xi32>
    %122 = arith.cmpi eq, %116, %121 : vector<4x8xi32>
    %123 = arith.extui %122 : vector<4x8xi1> to vector<4x8xi32>
    %124 = arith.sitofp %123 : vector<4x8xi32> to vector<4x8xf32>
    %125 = vector.broadcast %114 : vector<1x8xf32> to vector<4x8xf32>
    %126 = arith.mulf %119, %125 : vector<4x8xf32>
    %cst_99 = arith.constant dense<0.000000e+00> : vector<4xf32>
    %127 = vector.multi_reduction <add>, %126, %cst_99 [1] : vector<4x8xf32> to vector<4xf32>
    %128 = vector.shape_cast %127 : vector<4xf32> to vector<4x1xf32>
    %129 = vector.broadcast %114 : vector<1x8xf32> to vector<4x8xf32>
    %130 = arith.mulf %124, %129 : vector<4x8xf32>
    %cst_100 = arith.constant dense<0.000000e+00> : vector<4xf32>
    %131 = vector.multi_reduction <add>, %130, %cst_100 [1] : vector<4x8xf32> to vector<4xf32>
    %132 = vector.shape_cast %131 : vector<4xf32> to vector<4x1xf32>
    %133 = tpu.iota {dimensions = array<i32: 1>} : vector<1x8xi32>
    %c4_i32_101 = arith.constant 4 : i32
    %134 = vector.broadcast %c4_i32_101 : i32 to vector<1x8xi32>
    %135 = arith.cmpi slt, %133, %134 : vector<1x8xi32>
    %cst_102 = arith.constant 0.000000e+00 : f32
    %136 = vector.broadcast %cst_102 : f32 to vector<1x8xf32>
    %137 = arith.select %135, %114, %136 : vector<1x8xi1>, vector<1x8xf32>
    %cst_103 = arith.constant dense<0.000000e+00> : vector<1xf32>
    %138 = vector.multi_reduction <add>, %137, %cst_103 [1] : vector<1x8xf32> to vector<1xf32>
    %139 = vector.shape_cast %138 : vector<1xf32> to vector<1x1xf32>
    %c0_104 = arith.constant 0 : index
    %c0_105 = arith.constant 0 : index
    %c0_106 = arith.constant 0 : index
    %140 = vector.load %arg2[%c0_104, %c0_105, %c0_106] : memref<1x4x256xf32, #tpu.memory_space<vmem>>, vector<1x4x256xf32>
    %141 = vector.shape_cast %140 : vector<1x4x256xf32> to vector<4x256xf32>
    %142 = math.exp %128 : vector<4x1xf32>
    %143 = vector.broadcast %142 : vector<4x1xf32> to vector<4x256xf32>
    %144 = arith.mulf %141, %143 : vector<4x256xf32>
    %145 = vector.broadcast %132 : vector<4x1xf32> to vector<4x256xf32>
    %146 = arith.addf %144, %145 : vector<4x256xf32>
    %cst_107 = arith.constant 2.560000e+02 : f32
    %147 = vector.broadcast %cst_107 : f32 to vector<1x1xf32>
    %148 = arith.mulf %147, %139 : vector<1x1xf32>
    %c0_108 = arith.constant 0 : index
    %c0_109 = arith.constant 0 : index
    %c0_110 = arith.constant 0 : index
    %149 = vector.load %arg18[%c0_108, %c0_109, %c0_110] : memref<1x4x256xf32, #tpu.memory_space<vmem>>, vector<1x4x256xf32>
    %150 = vector.shape_cast %149 : vector<1x4x256xf32> to vector<4x256xf32>
    %151 = vector.shape_cast %146 : vector<4x256xf32> to vector<1x4x256xf32>
    tpu.vector_store %arg18[%c0_108, %c0_109, %c0_110], %151 {strides = array<i32>} : memref<1x4x256xf32, #tpu.memory_space<vmem>>, vector<1x4x256xf32>,
    %c0_111 = arith.constant 0 : index
    %c0_112 = arith.constant 0 : index
    %c0_113 = arith.constant 0 : index
    %152 = vector.load %arg19[%c0_111, %c0_112, %c0_113] : memref<1x1x1xf32, #tpu.memory_space<vmem>>, vector<1x1x1xf32>
    %153 = vector.shape_cast %152 : vector<1x1x1xf32> to vector<1x1xf32>
    %154 = vector.shape_cast %148 : vector<1x1xf32> to vector<1x1x1xf32>
    tpu.vector_store %arg19[%c0_111, %c0_112, %c0_113], %154 {strides = array<i32>} : memref<1x1x1xf32, #tpu.memory_space<vmem>>, vector<1x1x1xf32>,
    return
  }
  func.func @transform_0(%arg0: i32) -> (i32, i32, i32) {
    %c0_i32 = arith.constant 0 : i32
    %c0_i32_0 = arith.constant 0 : i32
    %c0_i32_1 = arith.constant 0 : i32
    return %arg0, %c0_i32, %c0_i32_0 : i32, i32, i32
  }
  func.func @transform_1(%arg0: i32) -> (i32, i32, i32) {
    %c0_i32 = arith.constant 0 : i32
    %c0_i32_0 = arith.constant 0 : i32
    %c0_i32_1 = arith.constant 0 : i32
    return %arg0, %c0_i32, %c0_i32_0 : i32, i32, i32
  }
  func.func @transform_2(%arg0: i32) -> (i32, i32, i32) {
    %c0_i32 = arith.constant 0 : i32
    %c0_i32_0 = arith.constant 0 : i32
    %c0_i32_1 = arith.constant 0 : i32
    %c0_i32_2 = arith.constant 0 : i32
    return %c0_i32, %c0_i32_0, %c0_i32_1 : i32, i32, i32
  }
  func.func @transform_3(%arg0: i32) -> (i32, i32, i32) {
    %c0_i32 = arith.constant 0 : i32
    %c0_i32_0 = arith.constant 0 : i32
    %c0_i32_1 = arith.constant 0 : i32
    %c0_i32_2 = arith.constant 0 : i32
    return %c0_i32, %c0_i32_0, %c0_i32_1 : i32, i32, i32
  }
  func.func @transform_4(%arg0: i32) -> (i32, i32) {
    %c0_i32 = arith.constant 0 : i32
    %c0_i32_0 = arith.constant 0 : i32
    %c0_i32_1 = arith.constant 0 : i32
    return %c0_i32, %c0_i32_0 : i32, i32
  }
  func.func @transform_5(%arg0: i32) -> (i32, i32, i32) {
    %c0_i32 = arith.constant 0 : i32
    %c0_i32_0 = arith.constant 0 : i32
    %c0_i32_1 = arith.constant 0 : i32
    %c0_i32_2 = arith.constant 0 : i32
    return %c0_i32, %c0_i32_0, %c0_i32_1 : i32, i32, i32
  }
  func.func @transform_6(%arg0: i32) -> (i32, i32, i32) {
    %c0_i32 = arith.constant 0 : i32
    %c0_i32_0 = arith.constant 0 : i32
    %c0_i32_1 = arith.constant 0 : i32
    %c0_i32_2 = arith.constant 0 : i32
    return %c0_i32, %c0_i32_0, %c0_i32_1 : i32, i32, i32
  }
  func.func @transform_7(%arg0: i32) -> (i32, i32) {
    %c0_i32 = arith.constant 0 : i32
    %c0_i32_0 = arith.constant 0 : i32
    %c0_i32_1 = arith.constant 0 : i32
    return %c0_i32, %c0_i32_0 : i32, i32
  }
  func.func @transform_8(%arg0: i32) -> (i32, i32, i32) {
    %c0_i32 = arith.constant 0 : i32
    %c0_i32_0 = arith.constant 0 : i32
    %c0_i32_1 = arith.constant 0 : i32
    %c0_i32_2 = arith.constant 0 : i32
    return %c0_i32, %c0_i32_0, %c0_i32_1 : i32, i32, i32
  }
  func.func @transform_9(%arg0: i32) -> (i32, i32, i32) {
    %c0_i32 = arith.constant 0 : i32
    %c0_i32_0 = arith.constant 0 : i32
    %c0_i32_1 = arith.constant 0 : i32
    %c0_i32_2 = arith.constant 0 : i32
    return %c0_i32, %c0_i32_0, %c0_i32_1 : i32, i32, i32
  }
  func.func @transform_10(%arg0: i32) -> (i32, i32) {
    %c0_i32 = arith.constant 0 : i32
    %c0_i32_0 = arith.constant 0 : i32
    %c0_i32_1 = arith.constant 0 : i32
    return %c0_i32, %c0_i32_0 : i32, i32
  }
  func.func @transform_11(%arg0: i32) -> (i32, i32) {
    %c0_i32 = arith.constant 0 : i32
    %c0_i32_0 = arith.constant 0 : i32
    %c0_i32_1 = arith.constant 0 : i32
    return %c0_i32, %c0_i32_0 : i32, i32
  }
  func.func @transform_12(%arg0: i32) -> (i32, i32) {
    %c0_i32 = arith.constant 0 : i32
    %c0_i32_0 = arith.constant 0 : i32
    %c0_i32_1 = arith.constant 0 : i32
    return %c0_i32, %c0_i32_0 : i32, i32
  }
  func.func @transform_13(%arg0: i32) -> (i32, i32) {
    %c0_i32 = arith.constant 0 : i32
    %c0_i32_0 = arith.constant 0 : i32
    %c0_i32_1 = arith.constant 0 : i32
    return %c0_i32, %c0_i32_0 : i32, i32
  }
  func.func @transform_14(%arg0: i32) -> (i32, i32) {
    %c0_i32 = arith.constant 0 : i32
    %c0_i32_0 = arith.constant 0 : i32
    %c0_i32_1 = arith.constant 0 : i32
    return %c0_i32, %c0_i32_0 : i32, i32
  }
  func.func @transform_15(%arg0: i32) -> (i32, i32) {
    %c0_i32 = arith.constant 0 : i32
    %c0_i32_0 = arith.constant 0 : i32
    %c0_i32_1 = arith.constant 0 : i32
    return %c0_i32, %c0_i32_0 : i32, i32
  }
  func.func @transform_16(%arg0: i32) -> (i32, i32) {
    %c0_i32 = arith.constant 0 : i32
    %c0_i32_0 = arith.constant 0 : i32
    %c0_i32_1 = arith.constant 0 : i32
    return %c0_i32, %c0_i32_0 : i32, i32
  }
  func.func @transform_17(%arg0: i32) -> (i32, i32, i32) {
    %c0_i32 = arith.constant 0 : i32
    %c0_i32_0 = arith.constant 0 : i32
    %c0_i32_1 = arith.constant 0 : i32
    return %arg0, %c0_i32, %c0_i32_0 : i32, i32, i32
  }
  func.func @transform_18(%arg0: i32) -> (i32, i32, i32) {
    %c0_i32 = arith.constant 0 : i32
    %c0_i32_0 = arith.constant 0 : i32
    %c0_i32_1 = arith.constant 0 : i32
    return %arg0, %c0_i32, %c0_i32_0 : i32, i32, i32
  }
}

</mosaic_0001>

<bundles_post_ra>
// kernel: _fused_apply.1
= control target key start
LH: loop header
LB: loop body
LE: loop exit
PB: predicated region body
PF: predicated region fallthrough
CT: control target
= control target key end

     0   :  { %s2612_s27 = smov 0   ;;  %s2906_s0 = inlined_call_operand.vmem [shape: f32[2,16,64], index: 0, kind: input, shape index: {}]   ;;  %s2907_s1 = inlined_call_operand.vmem [shape: f32[2,4,256], index: 1, kind: input, shape index: {}]   ;;  %s2908_s2 = inlined_call_operand.vmem [shape: bf16[3,64,64], index: 2, kind: input, shape index: {}]   ;;  %s2909_s3 = inlined_call_operand.vmem [shape: bf16[3,8,16], index: 3, kind: input, shape index: {}]   ;;  %s2910_s4 = inlined_call_operand.vmem [shape: f32[1,64], index: 4, kind: input, shape index: {}]   ;;  %s2911_s5 = inlined_call_operand.vmem [shape: bf16[3,64,32], index: 5, kind: input, shape index: {}]   ;;  %s2912_s6 = inlined_call_operand.vmem [shape: bf16[3,4,8], index: 6, kind: input, shape index: {}]   ;;  %s2913_s7 = inlined_call_operand.vmem [shape: f32[1,32], index: 7, kind: input, shape index: {}]   ;;  %s2914_s8 = inlined_call_operand.vmem [shape: bf16[3,32,16], index: 8, kind: input, shape index: {}]   ;;  %s2915_s9 = inlined_call_operand.vmem [shape: bf16[3,2,4], index: 9, kind: input, shape index: {}]   ;;  %s2916_s10 = inlined_call_operand.vmem [shape: f32[1,16], index: 10, kind: input, shape index: {}]   ;;  %s2917_s11 = inlined_call_operand.vmem [shape: bf16[32,32], index: 11, kind: input, shape index: {}]   ;;  %s2918_s12 = inlined_call_operand.vmem [shape: f32[1,32], index: 12, kind: input, shape index: {}]   ;;  %s2919_s13 = inlined_call_operand.vmem [shape: bf16[32,32], index: 13, kind: input, shape index: {}]   ;;  %s2920_s14 = inlined_call_operand.vmem [shape: f32[1,32], index: 14, kind: input, shape index: {}]   ;;  %s2921_s15 = inlined_call_operand.vmem [shape: bf16[32,8], index: 15, kind: input, shape index: {}]   ;;  %s2922_s16 = inlined_call_operand.vmem [shape: f32[1,8], index: 16, kind: input, shape index: {}]   ;;  %s2923_s17 = inlined_call_operand.vmem [shape: f32[2,4,256], index: 17, kind: output, shape index: {0}]   ;;  %s2924_s18 = inlined_call_operand.vmem [shape: f32[2,1,1], index: 18, kind: output, shape index: {1}]  }
   0x1   :  { %2927 = sst [smem:[#allocation3_spill]] %s2906_s0 }
   0x2   :  { %2928 = sst [smem:[#allocation4_spill]] %s2907_s1 }
   0x3   :  { %2929 = sst [smem:[#allocation5_spill]] %s2908_s2 }
   0x4 LB: > { %2930 = sst [smem:[#allocation2_spill]] %s2512_s27  ;;  %s2080_s28 = sadd.s32 4294967295, %s2512_s27   ;;  %s2512_s27 = sphi %s2612_s27, %s29_s27  }
   0x5   : > { %p2084_p0 = scmp.ge.s32.totalorder %s2512_s27, 1  ;;  %p525_p1 = scmp.lt.s32.totalorder %s2512_s27, 3 }
   0x7   : > { %p526_p2 = pnand %p2084_p0, %p525_p1 }
   0x8   : > { %p587_p3 = scmp.lt.s32.totalorder (!%p526_p2), %s2080_s28, 1  ;;  %v2514_v0 = vmov (!%p526_p2), 0.0   ;;  %vm2515_vm0 = vmmov (!%p526_p2), 0   ;;  %s2931_s19 = sld [smem:[#allocation3_spill]] (!%p526_p2)  ;;  %v609_v4 = vld [vmem:[%s2909_s3] sm:$0xf] (!%p526_p2) }
   0x9   : > { %529 = sbr.rel (%p526_p2) target bundleno = 2857 (0xb29), region = 88  ;;  %2272 = vmatprep.subr.bf16.mxu0 (!%p526_p2), %v2514_v0  ;;  %2278 = vmatprep.subr.bf16.mxu1 (!%p526_p2), %v2514_v0  ;;  %vm610_vm1 = vcmask (!%p526_p2), 130048   ;;  %v2092_v5 = vld [vmem:[%s2909_s3 + $0x4] sm:$0xf] (!%p526_p2)  ;;  %s2932_s25 = sld [smem:[#allocation5_spill]] (!%p526_p2)  ;;  %vm742_vm2 = vcmask (!%p526_p2), 523264  }
   0xa   : > { %2274 = vmatprep.mubr.msk.bf16.mxu0 (!%p526_p2), %vm2515_vm0, %v2514_v0  ;;  %2280 = vmatprep.mubr.msk.bf16.mxu1 (!%p526_p2), %vm2515_vm0, %v2514_v0  ;;  %v2112_v25 = vld [vmem:[%s2909_s3 + $0x8] sm:$0xf] (!%p526_p2)  ;;  %v2480_v43 = vld [vmem:[%s2911_s5 + $0x20] sm:$0xff] (!%p526_p2)   ;;  %vm991_vm3 = vcmask (!%p526_p2), 1043456   ;;  %vm987_vm4 = vcmask (!%p526_p2), 64512   ;;  %v2481_v59 = vld [vmem:[%s2911_s5 + $0x10] sm:$0xff] (!%p526_p2)  }
   0xb   : > { %v2482_v44 = vld [vmem:[%s2911_s5 + $0x28] sm:$0xff] (!%p526_p2)   ;;  %v2127_v46 = vld [vmem:[%s2910_s4] ss:$0 sm:$0xff] (!%p526_p2)  ;;  %v2129_v56 = vld [vmem:[%s2912_s6 + $0x2] sm:$0x3] (!%p526_p2)  ;;  %vm1371_vm5 = vcmask (!%p526_p2), 1041408  }
   0xc   : > { %v986_v55 = vld [vmem:[%s2912_s6] sm:$0x3] (!%p526_p2)  ;;  %v2479_v58 = vld [vmem:[%s2911_s5 + $0x8] sm:$0xff] (!%p526_p2)   ;;  %v2483_v60 = vld [vmem:[%s2911_s5 + $0x18] sm:$0xff] (!%p526_p2)   ;;  %vm1367_vm6 = vcmask (!%p526_p2), 31744   ;;  %vm1483_vm7 = vcmask (!%p526_p2), 261120  }
   0xd   : > { %v2478_v57 = vld [vmem:[%s2911_s5] sm:$0xff] (!%p526_p2)   ;;  %v2484_v61 = vld [vmem:[%s2911_s5 + $0x30] sm:$0xff] (!%p526_p2)   ;;  %v2485_v62 = vld [vmem:[%s2911_s5 + $0x38] sm:$0xff] (!%p526_p2)   ;;  %vm1957_vm10 = vcmask (!%p526_p2), 57344   ;;  %vm1947_vm12 = vcmask (!%p526_p2), 60416   ;;  %vm1986_vm13 = vcmask (!%p526_p2), 0  }
   0xe   : > { %s2933_s2 = sld [smem:[#allocation4_spill]] (!%p526_p2) }
   0xf   : > { %v2466_v6 = vld [vmem:[%s2932_s25 + $0x20] sm:$0xff] (!%p526_p2)   ;;  %v2468_v8 = vld [vmem:[%s2932_s25 + $0x28] sm:$0xff] (!%p526_p2)   ;;  %v2470_v10 = vld [vmem:[%s2932_s25 + $0x30] sm:$0xff] (!%p526_p2)  }
  0x10   : > { %s2936_s28 = smov (!%p587_p3, %s2080_s28), 1  ;;  %v2467_v7 = vld [vmem:[%s2932_s25] sm:$0xff]   ;;  %v2469_v9 = vld [vmem:[%s2932_s25 + $0x8] sm:$0xff]   ;;  %v2471_v11 = vld [vmem:[%s2932_s25 + $0x10] sm:$0xff]  }
  0x11   : > { %s2202_s29 = sshll.u32 %s2936_s28, 4  ;;  %v2472_v12 = vld [vmem:[%s2932_s25 + $0x38] sm:$0xff]   ;;  %v2474_v20 = vld [vmem:[%s2932_s25 + $0x40] sm:$0xff]   ;;  %v2475_v26 = vld [vmem:[%s2932_s25 + $0x48] sm:$0xff]   ;;  %s2203_s20 = sshll.u32 %s2936_s28, 3 }
  0x12   : > { %s591_s1 = scalar_lea.vmem %s2931_s19, %s2202_s29  ;;  %v2473_v13 = vld [vmem:[%s2932_s25 + $0x18] sm:$0xff]   ;;  %v2476_v27 = vld [vmem:[%s2932_s25 + $0x50] sm:$0xff]   ;;  %s601_s29 = scalar_lea.vmem %s2923_s17, %s2203_s20 }
  0x13   : > { %v606_v1 = vld [vmem:[%s591_s1] sm:$0xff]  ;;  %v607_v2 = vld [vmem:[%s591_s1 + $0x8] sm:$0xff]  ;;  %v2477_v28 = vld [vmem:[%s2932_s25 + $0x58] sm:$0xff]   ;;  %s604_s1 = scalar_lea.vmem %s2924_s18, %s2936_s28 }
  0x14   : > { %v608_v3 = vpack.c.bf16 %v607_v2, %v606_v1  ;;  %s596_s23 = scalar_lea.vmem %s2933_s2, %s2203_s20 }
  0x16   : > { %2273 = vmatpush3.bf16.msra.mxu0 %v608_v3  ;;  %2279 = vmatpush3.bf16.msra.mxu1 %v608_v3 }
  0x17   : > { %2284 = vmatprep.subr.bf16.mxu0 %v2514_v0  ;;  %2296 = vmatprep.subr.bf16.mxu1 %v2514_v0 }
  0x19   : > { %2275 = vmatmul.mubr.msk.bf16.vlgmr.msra.gmra.mrb[0].mxu0 %vm610_vm1, %v609_v4  ;;  %2281 = vmatmul.mubr.msk.bf16.vlgmr.msra.gmra.mrb[0].mxu1 %vm610_vm1, %v2092_v5 }
  0x1a   : > { %2285 = vmatpush3.bf16.msra.mxu0 %v2466_v6  ;;  %2297 = vmatpush3.bf16.msra.mxu1 %v2467_v7 }
  0x1b   : > { %2286 = vmatprep.subr.bf16.mxu0 %v2514_v0  ;;  %2298 = vmatprep.subr.bf16.mxu1 %v2514_v0 }
  0x1c   : > { %2292 = vmatprep.mubr.msk.bf16.mxu0 %vm2515_vm0, %v2514_v0  ;;  %2304 = vmatprep.mubr.msk.bf16.mxu1 %vm2515_vm0, %v2514_v0 }
  0x1e   : > { %2287 = vmatpush3.bf16.msra.mxu0 %v2468_v8  ;;  %2299 = vmatpush3.bf16.msra.mxu1 %v2469_v9 }
  0x1f   : > { %2288 = vmatprep.subr.bf16.mxu0 %v2514_v0  ;;  %2300 = vmatprep.subr.bf16.mxu1 %v2514_v0 }
  0x22   : > { %2289 = vmatpush3.bf16.msra.mxu0 %v2470_v10  ;;  %2301 = vmatpush3.bf16.msra.mxu1 %v2471_v11  ;;  %v2149_v10 = vld [vmem:[%s2912_s6 + $0x4] sm:$0x3] }
  0x23   : > { %2290 = vmatprep.subr.bf16.mxu0 %v2514_v0  ;;  %2302 = vmatprep.subr.bf16.mxu1 %v2514_v0  ;;  %v2486_v11 = vld [vmem:[%s2911_s5 + $0x40] sm:$0xff]  }
  0x26   : > { %2291 = vmatpush3.bf16.msra.mxu0 %v2472_v12  ;;  %2303 = vmatpush3.bf16.msra.mxu1 %v2473_v13  ;;  %v2487_v12 = vld [vmem:[%s2911_s5 + $0x48] sm:$0xff]   ;;  %v2488_v13 = vld [vmem:[%s2911_s5 + $0x50] sm:$0xff]  }
  0x27   : > { %2308 = vmatprep.subr.bf16.mxu0 %v2514_v0  ;;  %2314 = vmatprep.subr.bf16.mxu1 %v2514_v0 }
  0xec   : > { %v648_v14 = vpop.f32.mrb[0].mxu0  ;;  %v702_v15 = vpop.f32.mrb[0].mxu1 }
  0xed   : > { %v654_v16 = vpack.c.bf16 %v648_v14, %v648_v14  ;;  %v708_v17 = vpack.c.bf16 %v702_v15, %v702_v15  ;;  %v2282_v18 = vpop.f32.mrb[1].mxu1  ;;  %v2276_v19 = vpop.f32.mrb[1].mxu0  ;;  %v2489_v14 = vld [vmem:[%s2911_s5 + $0x58] sm:$0xff]  }
  0xee   : > { %v705_v21 = vpop.f32.mrb[2].mxu1  ;;  %v651_v22 = vpop.f32.mrb[2].mxu0 }
  0xef   : > { %v2283_v23 = vpop.f32.mrb[3].mxu1  ;;  %2293 = vmatmul.mubr.msk.bf16.vlgmr.msra.gmra.mrb[4].mxu0 %vm742_vm2, %v708_v17  ;;  %2305 = vmatmul.mubr.msk.bf16.vlgmr.msra.gmra.mrb[4].mxu1 %vm742_vm2, %v654_v16  ;;  %v2277_v24 = vpop.f32.mrb[3].mxu0 }
  0xf0   : > { %2309 = vmatpush3.bf16.msra.mxu0 %v608_v3  ;;  %2310 = vmatprep.mubr.msk.bf16.mxu0 %vm2515_vm0, %v2514_v0 }
  0xf1   : > { %2315 = vmatpush3.bf16.msra.mxu1 %v2474_v20  ;;  %2322 = vmatprep.mubr.msk.bf16.mxu1 %vm2515_vm0, %v2514_v0 }
  0xf2   : > { %2316 = vmatprep.subr.bf16.mxu1 %v2514_v0  ;;  %2326 = vmatprep.subr.bf16.mxu0 %v2514_v0 }
  0xf5   : > { %2317 = vmatpush3.bf16.msra.mxu1 %v2475_v26 }
  0xf6   : > { %2318 = vmatprep.subr.bf16.mxu1 %v2514_v0 }
  0xf7   : > { %2311 = vmatmul.mubr.msk.bf16.vlgmr.msra.gmra.mrb[8].mxu0 %vm610_vm1, %v2112_v25 }
  0xf8   : > { %2328 = vmatprep.mubr.msk.bf16.mxu0 %vm2515_vm0, %v2514_v0 }
  0xf9   : > { %2319 = vmatpush3.bf16.msra.mxu1 %v2476_v27 }
  0xfa   : > { %2320 = vmatprep.subr.bf16.mxu1 %v2514_v0 }
  0xfd   : > { %2321 = vmatpush3.bf16.msra.mxu1 %v2477_v28 }
  0xfe   : > { %2338 = vmatprep.subr.bf16.mxu1 %v2514_v0 }
 0x1c2   : > { %v780_v29 = vpop.f32.mrb[4].mxu0  ;;  %v847_v30 = vpop.f32.mrb[4].mxu1 }
 0x1c3   : > { %v848_v31 = vadd.f32 %v847_v30, %v780_v29  ;;  %v2294_v32 = vpop.f32.mrb[5].mxu0  ;;  %v2306_v33 = vpop.f32.mrb[5].mxu1  ;;  %v2164_v30 = vld [vmem:[%s2913_s7] ss:$0 sm:$0xff] }
 0x1c4   : > { %v783_v34 = vpop.f32.mrb[6].mxu0  ;;  %v850_v35 = vpop.f32.mrb[6].mxu1 }
 0x1c5   : > { %v2295_v36 = vpop.f32.mrb[7].mxu0  ;;  %v2307_v37 = vpop.f32.mrb[7].mxu1 }
 0x1ca   : > { %v892_v38 = vpop.f32.mrb[8].mxu0 }
 0x1cb   : > { %v898_v39 = vpack.c.bf16 %v892_v38, %v892_v38  ;;  %v2312_v40 = vpop.f32.mrb[9].mxu0 }
 0x1cc   : > { %v895_v41 = vpop.f32.mrb[10].mxu0  ;;  %v2166_v40 = vld [vmem:[%s2915_s9 + $0x1] sm:$0x1] }
 0x1cd   : > { %v2313_v42 = vpop.f32.mrb[11].mxu0  ;;  %2323 = vmatmul.mubr.msk.bf16.vlgmr.msra.gmra.mrb[8].mxu1 %vm742_vm2, %v898_v39  ;;  %v1366_v39 = vld [vmem:[%s2915_s9] sm:$0x1] }
 0x1ce   : > { %2346 = vmatprep.mubr.msk.bf16.mxu1 %vm2515_vm0, %v2514_v0  ;;  %2339 = vmatpush3.bf16.msra.mxu1 %v2480_v43  ;;  %v2490_v41 = vld [vmem:[%s2914_s8] sm:$0xff]   ;;  %v2491_v42 = vld [vmem:[%s2914_s8 + $0x8] sm:$0xff]   ;;  %v2492_v43 = vld [vmem:[%s2914_s8 + $0x10] sm:$0xff]  }
 0x1cf   : > { %2340 = vmatprep.subr.bf16.mxu1 %v2514_v0 }
 0x1d2   : > { %2341 = vmatpush3.bf16.msra.mxu1 %v2482_v44  ;;  %v2493_v44 = vld [vmem:[%s2914_s8 + $0x18] sm:$0xff]  }
 0x1d3   : > { %2342 = vmatprep.subr.bf16.mxu1 %v2514_v0 }
 0x1d6   : > { %2343 = vmatpush3.bf16.msra.mxu1 %v2484_v61 }
 0x1d7   : > { %2344 = vmatprep.subr.bf16.mxu1 %v2514_v0 }
 0x1da   : > { %2345 = vmatpush3.bf16.msra.mxu1 %v2485_v62 }
 0x1db   : > { %2362 = vmatprep.subr.bf16.mxu1 %v2514_v0 }
 0x2a0   : > { %v969_v45 = vpop.f32.mrb[8].mxu1 }
 0x2a1   : > { %v975_v47 = vadd.f32 %v969_v45, %v848_v31  ;;  %v2324_v48 = vpop.f32.mrb[9].mxu1 }
 0x2a2   : > { %v972_v49 = vpop.f32.mrb[10].mxu1 }
 0x2a3   : > { %v983_v50 = vadd.f32 %v2127_v46, %v975_v47  ;;  %v2325_v51 = vpop.f32.mrb[11].mxu1 }
 0x2a5   : > { %v984_v52 = vmax.f32 %v983_v50, 0.0 }
 0x2a7   : > { %v985_v53 = vpack.c.bf16 %v984_v52, %v984_v52 }
 0x2a9   : > { %v993_v54 = vsel %vm991_vm3, %v985_v53, 0 }
 0x2aa   : > { %2327 = vmatpush3.bf16.msra.mxu0 %v993_v54 }
 0x2ab   : > { %2332 = vmatprep.subr.bf16.mxu0 %v2514_v0 }
 0x2ad   : > { %2329 = vmatmul.mubr.msk.bf16.vlgmr.msra.gmra.mrb[12].mxu0 %vm987_vm4, %v986_v55  ;;  %v2178_v55 = vld [vmem:[%s2915_s9 + $0x2] sm:$0x1] }
 0x2ae   : > { %2333 = vmatpush3.bf16.msra.mxu0 %v993_v54  ;;  %2334 = vmatprep.mubr.msk.bf16.mxu0 %vm2515_vm0, %v2514_v0 }
 0x2af   : > { %2350 = vmatprep.subr.bf16.mxu0 %v2514_v0 }
 0x2b5   : > { %2335 = vmatmul.mubr.msk.bf16.vlgmr.msra.gmra.mrb[16].mxu0 %vm987_vm4, %v2129_v56  ;;  %v2494_v56 = vld [vmem:[%s2914_s8 + $0x20] sm:$0xff]  }
 0x2b6   : > { %2351 = vmatpush3.bf16.msra.mxu0 %v2478_v57  ;;  %2358 = vmatprep.mubr.msk.bf16.mxu0 %vm2515_vm0, %v2514_v0  ;;  %v2495_v57 = vld [vmem:[%s2914_s8 + $0x28] sm:$0xff]  }
 0x2b7   : > { %2352 = vmatprep.subr.bf16.mxu0 %v2514_v0 }
 0x2ba   : > { %2353 = vmatpush3.bf16.msra.mxu0 %v2479_v58 }
 0x2bb   : > { %2354 = vmatprep.subr.bf16.mxu0 %v2514_v0 }
 0x2be   : > { %2355 = vmatpush3.bf16.msra.mxu0 %v2481_v59 }
 0x2bf   : > { %2356 = vmatprep.subr.bf16.mxu0 %v2514_v0 }
 0x2c2   : > { %2357 = vmatpush3.bf16.msra.mxu0 %v2483_v60 }
 0x2c3   : > { %2368 = vmatprep.subr.bf16.mxu0 %v2514_v0 }
 0x380   : > { %v1029_v63 = vpop.f32.mrb[12].mxu0 }
 0x381   : > { %v1035_v1 = vpack.c.bf16 %v1029_v63, %v1029_v63  ;;  %v2330_v2 = vpop.f32.mrb[13].mxu0 }
 0x382   : > { %v1032_v3 = vpop.f32.mrb[14].mxu0 }
 0x383   : > { %v2331_v4 = vpop.f32.mrb[15].mxu0  ;;  %2359 = vmatmul.mubr.msk.bf16.vlgmr.msra.gmra.mrb[20].mxu0 %vm742_vm2, %v1035_v1 }
 0x384   : > { %2376 = vmatprep.mubr.msk.bf16.mxu0 %vm2515_vm0, %v2514_v0  ;;  %2369 = vmatpush3.bf16.msra.mxu0 %v2486_v11  ;;  %v2187_v11 = vld [vmem:[%s2916_s10] ss:$0 sm:$0xff] }
 0x385   : > { %2370 = vmatprep.subr.bf16.mxu0 %v2514_v0 }
 0x388   : > { %v1083_v5 = vpop.f32.mrb[16].mxu0  ;;  %2371 = vmatpush3.bf16.msra.mxu0 %v2487_v12 }
 0x389   : > { %v1089_v6 = vpack.c.bf16 %v1083_v5, %v1083_v5  ;;  %v2336_v7 = vpop.f32.mrb[17].mxu0  ;;  %2372 = vmatprep.subr.bf16.mxu0 %v2514_v0 }
 0x38a   : > { %v1086_v8 = vpop.f32.mrb[18].mxu0 }
 0x38b   : > { %v2337_v9 = vpop.f32.mrb[19].mxu0  ;;  %2347 = vmatmul.mubr.msk.bf16.vlgmr.msra.gmra.mrb[12].mxu1 %vm742_vm2, %v1089_v6 }
 0x38c   : > { %2363 = vmatpush3.bf16.msra.mxu1 %v993_v54  ;;  %2364 = vmatprep.mubr.msk.bf16.mxu1 %vm2515_vm0, %v2514_v0  ;;  %v2496_v9 = vld [vmem:[%s2917_s11] sm:$0xff]  }
 0x38d   : > { %2380 = vmatprep.subr.bf16.mxu1 %v2514_v0  ;;  %2373 = vmatpush3.bf16.msra.mxu0 %v2488_v13 }
 0x38e   : > { %2374 = vmatprep.subr.bf16.mxu0 %v2514_v0 }
 0x391   : > { %2375 = vmatpush3.bf16.msra.mxu0 %v2489_v14 }
 0x392   : > { %2392 = vmatprep.subr.bf16.mxu0 %v2514_v0 }
 0x393   : > { %2365 = vmatmul.mubr.msk.bf16.vlgmr.msra.gmra.mrb[16].mxu1 %vm987_vm4, %v2149_v10 }
 0x394   : > { %2382 = vmatprep.mubr.msk.bf16.mxu1 %vm2515_vm0, %v2514_v0 }
 0x456   : > { %v1227_v15 = vpop.f32.mrb[20].mxu0 }
 0x457   : > { %v2360_v16 = vpop.f32.mrb[21].mxu0 }
 0x458   : > { %v1230_v17 = vpop.f32.mrb[22].mxu0 }
 0x459   : > { %v2361_v18 = vpop.f32.mrb[23].mxu0 }
 0x45a   : > { %v2497_v18 = vld [vmem:[%s2917_s11 + $0x8] sm:$0xff]  }
 0x45e   : > { %v1160_v19 = vpop.f32.mrb[12].mxu1 }
 0x45f   : > { %v1228_v20 = vadd.f32 %v1227_v15, %v1160_v19  ;;  %v2348_v21 = vpop.f32.mrb[13].mxu1 }
 0x460   : > { %v1163_v22 = vpop.f32.mrb[14].mxu1  ;;  %v2498_v21 = vld [vmem:[%s2919_s13] sm:$0xff]  }
 0x461   : > { %v2349_v23 = vpop.f32.mrb[15].mxu1  ;;  %v2499_v22 = vld [vmem:[%s2919_s13 + $0x8] sm:$0xff]  }
 0x462   : > { %v1698_v23 = vld [vmem:[%s2918_s12] sm:$0x1] }
 0x466   : > { %v1272_v24 = vpop.f32.mrb[16].mxu1 }
 0x467   : > { %v1278_v25 = vpack.c.bf16 %v1272_v24, %v1272_v24  ;;  %v2366_v26 = vpop.f32.mrb[17].mxu1 }
 0x468   : > { %v1275_v27 = vpop.f32.mrb[18].mxu1 }
 0x469   : > { %v2367_v28 = vpop.f32.mrb[19].mxu1  ;;  %2377 = vmatmul.mubr.msk.bf16.vlgmr.msra.gmra.mrb[24].mxu0 %vm742_vm2, %v1278_v25 }
 0x46a   : > { %2396 = vmatprep.mubr.msk.bf16.mxu0 %vm2515_vm0, %v2514_v0  ;;  %2393 = vmatpush3.bf16.msra.mxu0 %v2492_v43  ;;  %v1931_v43 = vlaneseq }
 0x46b   : > { %2394 = vmatprep.subr.bf16.mxu0 %v2514_v0 }
 0x46e   : > { %2395 = vmatpush3.bf16.msra.mxu0 %v2493_v44 }
 0x46f   : > { %2408 = vmatprep.subr.bf16.mxu0 %v2514_v0 }
 0x53c   : > { %v1349_v29 = vpop.f32.mrb[24].mxu0 }
 0x53d   : > { %v1355_v31 = vadd.f32 %v1349_v29, %v1228_v20  ;;  %v2378_v32 = vpop.f32.mrb[25].mxu0 }
 0x53e   : > { %v1352_v33 = vpop.f32.mrb[26].mxu0  ;;  %v2501_v32 = vld [vmem:[%s2921_s15 + $0x8] sm:$0xff]  }
 0x53f   : > { %v1363_v34 = vadd.f32 %v2164_v30, %v1355_v31  ;;  %v2379_v35 = vpop.f32.mrb[27].mxu0  ;;  %v2500_v31 = vld [vmem:[%s2921_s15] sm:$0xff]  }
 0x540   : > { %v1812_v33 = vld [vmem:[%s2920_s14] sm:$0x1] }
 0x541   : > { %v1364_v36 = vmax.f32 %v1363_v34, 0.0 }
 0x543   : > { %v1365_v37 = vpack.c.bf16 %v1364_v36, %v1364_v36 }
 0x545   : > { %v1373_v38 = vsel %vm1371_vm5, %v1365_v37, 0 }
 0x546   : > { %2381 = vmatpush3.bf16.msra.mxu1 %v1373_v38 }
 0x547   : > { %2386 = vmatprep.subr.bf16.mxu1 %v2514_v0 }
 0x549   : > { %2383 = vmatmul.mubr.msk.bf16.vlgmr.msra.gmra.mrb[20].mxu1 %vm1367_vm6, %v1366_v39 }
 0x54a   : > { %2387 = vmatpush3.bf16.msra.mxu1 %v1373_v38  ;;  %2388 = vmatprep.mubr.msk.bf16.mxu1 %vm2515_vm0, %v2514_v0 }
 0x54b   : > { %2400 = vmatprep.subr.bf16.mxu1 %v2514_v0 }
 0x551   : > { %2389 = vmatmul.mubr.msk.bf16.vlgmr.msra.gmra.mrb[24].mxu1 %vm1367_vm6, %v2166_v40 }
 0x552   : > { %2401 = vmatpush3.bf16.msra.mxu1 %v2490_v41  ;;  %2404 = vmatprep.mubr.msk.bf16.mxu1 %vm2515_vm0, %v2514_v0  ;;  %v1874_v41 = vld [vmem:[%s2922_s16] sm:$0x1] }
 0x553   : > { %2402 = vmatprep.subr.bf16.mxu1 %v2514_v0 }
 0x556   : > { %2403 = vmatpush3.bf16.msra.mxu1 %v2491_v42 }
 0x557   : > { %2414 = vmatprep.subr.bf16.mxu1 %v2514_v0 }
 0x61c   : > { %v1409_v45 = vpop.f32.mrb[20].mxu1 }
 0x61d   : > { %v1415_v46 = vpack.c.bf16 %v1409_v45, %v1409_v45  ;;  %v2384_v47 = vpop.f32.mrb[21].mxu1 }
 0x61e   : > { %v1412_v48 = vpop.f32.mrb[22].mxu1 }
 0x61f   : > { %v2385_v49 = vpop.f32.mrb[23].mxu1  ;;  %2405 = vmatmul.mubr.msk.bf16.vlgmr.msra.gmra.mrb[28].mxu1 %vm1483_vm7, %v1415_v46  ;;  %v1932_v48 = vshrl.u32 %v1931_v43, 7 }
 0x620   : > { %2418 = vmatprep.mubr.msk.bf16.mxu1 %vm2515_vm0, %v2514_v0  ;;  %2415 = vmatpush3.bf16.msra.mxu1 %v2494_v56  ;;  %v1934_v49 = vand.u32 127, %v1931_v43 }
 0x621   : > { %2416 = vmatprep.subr.bf16.mxu1 %v2514_v0 }
 0x622   : > { %vm1935_vm8 = vcmp.eq.s32.totalorder %v1934_v49, %v1932_v48  ;;  %vm1955_vm9 = vcmp.lt.s32.totalorder %v1934_v49, 4 }
 0x624   : > { %v1459_v50 = vpop.f32.mrb[24].mxu1  ;;  %2417 = vmatpush3.bf16.msra.mxu1 %v2495_v57 }
 0x625   : > { %v1465_v51 = vpack.c.bf16 %v1459_v50, %v1459_v50  ;;  %v2390_v52 = vpop.f32.mrb[25].mxu1  ;;  %2434 = vmatprep.subr.bf16.mxu1 %v2514_v0  ;;  %v1938_v50 = vadd.s32 4, %v1932_v48 }
 0x626   : > { %v1462_v53 = vpop.f32.mrb[26].mxu1 }
 0x627   : > { %2397 = vmatmul.mubr.msk.bf16.vlgmr.msra.gmra.mrb[28].mxu0 %vm1483_vm7, %v1465_v51  ;;  %v2391_v54 = vpop.f32.mrb[27].mxu1  ;;  %v1944_v51 = vsub.s32 0, %v1932_v48  ;;  %vm1939_vm11 = vcmp.eq.s32.totalorder %v1934_v49, %v1938_v50  ;;  %v2198_v53 = vsel %vm1935_vm8, 1.0, %v2514_v0 }
 0x628   : > { %2409 = vmatpush3.bf16.msra.mxu0 %v1373_v38  ;;  %2410 = vmatprep.mubr.msk.bf16.mxu0 %vm2515_vm0, %v2514_v0  ;;  %v2199_v57 = vsel %vm1939_vm11, 1.0, %v2514_v0 }
 0x629   : > { %2422 = vmatprep.subr.bf16.mxu0 %v2514_v0 }
 0x62f   : > { %2411 = vmatmul.mubr.msk.bf16.vlgmr.msra.gmra.mrb[32].mxu0 %vm1367_vm6, %v2178_v55 }
 0x630   : > { %2424 = vmatprep.mubr.msk.bf16.mxu0 %vm2515_vm0, %v2514_v0  ;;  %2423 = vmatpush3.bf16.msra.mxu0 %v2496_v9 }
 0x631   : > { %2428 = vmatprep.subr.bf16.mxu0 %v2514_v0 }
 0x6f2   : > { %v1576_v58 = vpop.f32.mrb[28].mxu1 }
 0x6f3   : > { %v2406_v59 = vpop.f32.mrb[29].mxu1 }
 0x6f4   : > { %v1579_v60 = vpop.f32.mrb[30].mxu1 }
 0x6f5   : > { %v2407_v61 = vpop.f32.mrb[31].mxu1 }
 0x6fa   : > { %v1521_v62 = vpop.f32.mrb[28].mxu0 }
 0x6fb   : > { %v1577_v63 = vadd.f32 %v1576_v58, %v1521_v62  ;;  %v2398_v1 = vpop.f32.mrb[29].mxu0 }
 0x6fc   : > { %v1524_v2 = vpop.f32.mrb[30].mxu0 }
 0x6fd   : > { %v2399_v3 = vpop.f32.mrb[31].mxu0 }
 0x702   : > { %v1621_v4 = vpop.f32.mrb[32].mxu0 }
 0x703   : > { %v1627_v5 = vpack.c.bf16 %v1621_v4, %v1621_v4  ;;  %v2412_v6 = vpop.f32.mrb[33].mxu0 }
 0x704   : > { %v1624_v7 = vpop.f32.mrb[34].mxu0 }
 0x705   : > { %2419 = vmatmul.mubr.msk.bf16.vlgmr.msra.gmra.mrb[32].mxu1 %vm1483_vm7, %v1627_v5  ;;  %v2413_v8 = vpop.f32.mrb[35].mxu0  ;;  %v1961_v7 = vld [vmem:[%s596_s23] sm:$0xff] }
 0x706   : > { %2438 = vmatprep.mubr.msk.bf16.mxu1 %vm2515_vm0, %v2514_v0  ;;  %2435 = vmatpush3.bf16.msra.mxu1 %v2498_v21 }
 0x707   : > { %2436 = vmatprep.subr.bf16.mxu1 %v2514_v0 }
 0x70a   : > { %2437 = vmatpush3.bf16.msra.mxu1 %v2499_v22 }
 0x70b   : > { %2442 = vmatprep.subr.bf16.mxu1 %v2514_v0 }
 0x7d8   : > { %v1682_v10 = vpop.f32.mrb[32].mxu1 }
 0x7d9   : > { %v1688_v12 = vadd.f32 %v1682_v10, %v1577_v63  ;;  %v2420_v13 = vpop.f32.mrb[33].mxu1 }
 0x7da   : > { %v1685_v14 = vpop.f32.mrb[34].mxu1 }
 0x7db   : > { %v1696_v15 = vadd.f32 %v2187_v11, %v1688_v12  ;;  %v2421_v16 = vpop.f32.mrb[35].mxu1 }
 0x7dd   : > { %v1697_v17 = vmax.f32 %v1696_v15, 0.0 }
 0x7df   : > { %v1699_v19 = vpack.c.bf16 %v1697_v17, %v1697_v17 }
 0x7e1   : > { %2425 = vmatmul.mubr.msk.bf16.vlgmr.msra.gmra.mrb[36].mxu0 %vm610_vm1, %v1699_v19  ;;  %v1754_v20 = vshrl.u32 %v1699_v19, 16 }
 0x7e2   : > { %2429 = vmatpush3.bf16.msra.mxu0 %v2497_v18  ;;  %2430 = vmatprep.mubr.msk.bf16.mxu0 %vm2515_vm0, %v2514_v0 }
 0x7ed   : > { %2431 = vmatmul.mubr.msk.bf16.vlgmr.msra.gmra.mrb[36].mxu0 %vm610_vm1, %v1754_v20 }
 0x8c0   : > { %v1799_v24 = vpop.f32.mrb[36].mxu0 }
 0x8c1   : > { %v2450_v25 = vadd.f32 %v1799_v24, %v1698_v23  ;;  %v2432_v26 = vpop.f32.mrb[37].mxu0 }
 0x8c2   : > { %v1802_v27 = vpop.f32.mrb[38].mxu0 }
 0x8c3   : > { %v1806_v28 = vmax.f32 %v2450_v25, 0.0  ;;  %v2433_v29 = vpop.f32.mrb[39].mxu0 }
 0x8c5   : > { %v1807_v30 = vpack.c.bf16 %v1806_v28, %v1806_v28 }
 0x8c7   : > { %2439 = vmatmul.mubr.msk.bf16.vlgmr.msra.gmra.mrb[36].mxu1 %vm1483_vm7, %v1807_v30 }
 0x8c8   : > { %2446 = vmatprep.mubr.msk.bf16.mxu1 %vm2515_vm0, %v2514_v0  ;;  %2443 = vmatpush3.bf16.msra.mxu1 %v2500_v31 }
 0x8c9   : > { %2444 = vmatprep.subr.bf16.mxu1 %v2514_v0  ;;  %v2516_v0 = vmov 839922192  }
 0x8ca   : > { %v1966_v3 = vunpack.c.l.s4 %v2516_v0 }
 0x8cc   : > { %2445 = vmatpush3.bf16.msra.mxu1 %v2501_v32  ;;  %v1967_v4 = vunpack.c.0.s8 %v1966_v3 }
 0x8ce   : > { %v1970_v5 = vsub.s32 %v1967_v4, %v1932_v48 }
 0x99a   : > { %v1862_v34 = vpop.f32.mrb[36].mxu1 }
 0x99b   : > { %v1863_v35 = vadd.f32 %v1862_v34, %v1812_v33  ;;  %v2440_v36 = vpop.f32.mrb[37].mxu1 }
 0x99c   : > { %v1865_v37 = vpop.f32.mrb[38].mxu1 }
 0x99d   : > { %v1868_v38 = vmax.f32 %v1863_v35, 0.0  ;;  %v2441_v39 = vpop.f32.mrb[39].mxu1 }
 0x99f   : > { %v1869_v40 = vpack.c.bf16 %v1868_v38, %v1868_v38 }
 0x9a1   : > { %2447 = vmatmul.mubr.msk.bf16.vlgmr.msra.gmra.mrb[40].mxu1 %vm1483_vm7, %v1869_v40 }
 0xa74   : > { %v1924_v42 = vpop.f32.mrb[40].mxu1 }
 0xa75   : > { %v1925_v44 = vadd.f32 %v1924_v42, %v1874_v41  ;;  %v2448_v45 = vpop.f32.mrb[41].mxu1 }
 0xa76   : > { %v1927_v46 = vpop.f32.mrb[42].mxu1 }
 0xa77   : > { %2502 = vtanh.f32 %v1925_v44  ;;  %v2449_v47 = vpop.f32.mrb[43].mxu1 }
 0xa81   : > { %v2503_v52 = vpop.eup %2502 }
 0xa82   : > { %v1956_v54 = vsel %vm1955_vm9, %v2503_v52, 0.0  ;;  %v1945_v55 = vrot.slane %v2503_v52, %v1944_v51 }
 0xa83   : > { %v1958_v56 = vsel %vm1957_vm10, %v1956_v54, 0.0 }
 0xa84   : > { %1959 = vadd.xlane.f32.xlu1 %v1958_v56  ;;  %v1946_v58 = vmul.f32 %v2198_v53, %v1945_v55  ;;  %v1951_v60 = vmul.f32 %v2199_v57, %v1945_v55 }
 0xa86   : > { %v1948_v59 = vsel %vm1947_vm12, %v1946_v58, 0.0  ;;  %v1952_v61 = vsel %vm1947_vm12, %v1951_v60, 0.0 }
 0xa87   : > { %1949 = vadd.xlane.f32.xlu0 %v1948_v59 }
 0xa8b   : > { %1953 = vadd.xlane.f32.xlu0 %v1952_v61 }
 0xb11   : > { %v1960_v62 = vpop.xlane.xlu1 %1959 }
 0xb12   : > { %v1984_v63 = vmul.f32 256.0, %v1960_v62 }
 0xb14   : > { %1987 = vst.msk [vmem:[%s604_s1] sm:$0x1] %vm1986_vm13, %v1984_v63  ;;  %v1950_v1 = vpop.xlane.xlu0 %1949 }
 0xb15   : > { %v1962_v2 = vmul.f32 1.442695, %v1950_v1 }
 0xb17   : > { %2504 = vpow2.f32 %v1962_v2 }
 0xb18   : > { %v1954_v8 = vpop.xlane.xlu0 %1953 }
 0xb19   : > { %v1981_v11 = vrot.slane %v1954_v8, %v1970_v5 }
 0xb21   : > { %v2505_v6 = vpop.eup %2504 }
 0xb22   : > { %v1971_v9 = vrot.slane %v2505_v6, %v1970_v5 }
 0xb24   : > { %v1973_v10 = vmul.f32 %v1971_v9, %v1961_v7 }
 0xb26   : > { %v1983_v12 = vadd.f32 %v1981_v11, %v1973_v10 }
 0xb28   : > { %1985 = vst [vmem:[%s601_s29] sm:$0xff] %v1983_v12 }
 0xb29 PF: > { %s2934_s28 = sld [smem:[#allocation2_spill]] }
 0xb2f   : > { %s29_s27 = sadd.s32 1, %s2934_s28  }
 0xb30   : > { %p26_p4 = scmp.ge.s32.totalorder %s29_s27, 4  }
 0xb32   :  { %28 = sbr.rel (!%p26_p4) target bundleno = 4 (0x4), region = 145 }

</bundles_post_ra>
